<compile_context>
chip_gen: v6e
topology: v6e:2x2x1
jax: 0.10.0
libtpu: 0.0.40
codegen_flags: <defaults>
</compile_context>

<pallas_src>
import jax
import jax.numpy as jnp
from jax.experimental import pallas as pl
from jax.experimental.pallas import tpu as pltpu

_EPS = 1e-12  # matches torch.nn.functional.normalize default eps


def _round_up(x, m):
    return ((x + m - 1) // m) * m


# --------------------------------------------------------------------------
# Prologue kernel: normalize responses and mean-pool over the response axis.
# Runs exactly once (grid-invariant work is NOT re-done per label tile).
# --------------------------------------------------------------------------
def _pool_kernel(resp_ref, pooled_ref):
    resp = resp_ref[...].astype(jnp.float32)                      # (B, R, D)
    # F.normalize(x, p=2, dim=-1) == x * rsqrt(max(sum(x^2), eps^2))
    sumsq = jnp.sum(resp * resp, axis=-1, keepdims=True)          # (B, R, 1)
    resp_n = resp * jax.lax.rsqrt(jnp.maximum(sumsq, _EPS * _EPS))
    pooled_ref[...] = jnp.mean(resp_n, axis=1)                    # (B, D)


# --------------------------------------------------------------------------
# Streaming kernel: one lane-dense label tile of retrieval logits per step.
# --------------------------------------------------------------------------
def _logits_kernel(pooled_ref, labT_ref, out_ref):
    # pooled_ref : (B, D)   pooled, normalized responses (grid-invariant)
    # labT_ref   : (D, TL)  normalized label tile, pre-transposed in wrapper
    # out_ref    : (B, TL)  logits block
    out_ref[...] = jnp.dot(pooled_ref[...], labT_ref[...],
                           preferred_element_type=jnp.float32)


def _pick_label_tile(L, D, itemsize, budget_bytes=4 * 1024 * 1024):
    """Lane-dense (multiple of 128) label tile kept under a per-buffer VMEM
    budget; guarantees >= 2 grid steps whenever L > 128 (v7x megacore)."""
    if L <= 128:
        return L
    max_tile = max(128, (budget_bytes // (D * itemsize)) // 128 * 128)
    half = _round_up(-(-L // 2), 128)   # ceil(L/2) rounded up to 128
    return int(min(max_tile, half))


def llava2_logits(resp_embeds, label_embeds, *, label_tile=None,
                  matmul_dtype=jnp.bfloat16):
    """resp_embeds: (B, R, D) raw response embeddings;
       label_embeds: (L, D) raw label embeddings -> logits (B, L) float32.

    matmul_dtype=bfloat16 (default) halves the HBM label stream (~2x on this
    memory-bound kernel) with f32 MXU accumulation; pass jnp.float32 for
    bit-closer results.
    """
    B, R, D = resp_embeds.shape
    L, D2 = label_embeds.shape
    assert D == D2

    # Normalize the label table once outside the grid (mirrors the torch module
    # where set_encoded_labels stores pre-normalized embeddings), transpose to
    # (D, L) so the kernel RHS is a standard (K, N) operand, and cast to the
    # streaming dtype.
    lab_sumsq = jnp.sum(label_embeds.astype(jnp.float32) ** 2, axis=-1,
                        keepdims=True)
    labels_n = label_embeds.astype(jnp.float32) * jax.lax.rsqrt(
        jnp.maximum(lab_sumsq, _EPS * _EPS))
    labels_nT = labels_n.T.astype(matmul_dtype)                   # (D, L)

    # One-shot pooling prologue (Pallas): normalize + mean over R.
    pooled = pl.pallas_call(
        _pool_kernel,
        out_shape=jax.ShapeDtypeStruct((B, D), jnp.float32),
        grid=(1,),
        in_specs=[pl.BlockSpec((B, R, D), lambda i: (0, 0, 0))],
        out_specs=pl.BlockSpec((B, D), lambda i: (0, 0)),
    )(resp_embeds)
    pooled = pooled.astype(matmul_dtype)

    # VMEM-budgeted, lane-dense label tile; ragged final tile is masked by
    # Pallas (each output column depends only on its own label row, so padded
    # garbage never contaminates valid columns).
    itemsize = jnp.dtype(matmul_dtype).itemsize
    if label_tile is None:
        label_tile = _pick_label_tile(L, D, itemsize)
    num_l_tiles = pl.cdiv(L, label_tile)

    return pl.pallas_call(
        _logits_kernel,
        out_shape=jax.ShapeDtypeStruct((B, L), jnp.float32),
        grid_spec=pltpu.PrefetchScalarGridSpec(
            num_scalar_prefetch=0,
            grid=(num_l_tiles,),
            in_specs=[
                # pooled responses: tiny, grid-invariant
                pl.BlockSpec((B, D), lambda l: (0, 0)),
                # one label tile (columns of the (D, L) table) per grid step
                pl.BlockSpec((D, label_tile), lambda l: (0, l)),
            ],
            out_specs=pl.BlockSpec((B, label_tile), lambda l: (0, l)),
        ),
        compiler_params=pltpu.CompilerParams(
            dimension_semantics=("parallel",),
            vmem_limit_bytes=32 * 1024 * 1024,
        ),
    )(pooled, labels_nT)


def _reference(resp_embeds, label_embeds):
    rn = resp_embeds / jnp.maximum(
        jnp.linalg.norm(resp_embeds, axis=-1, keepdims=True), _EPS)
    ln = label_embeds / jnp.maximum(
        jnp.linalg.norm(label_embeds, axis=-1, keepdims=True), _EPS)
    return jnp.einsum("brd,ld->brl", rn, ln).mean(axis=1)


if __name__ == "__main__":
    # TODO(synk): the LLaVA LLM generation and the CLIP text/vision encoders
    # (pretrained transformers that produce these embeddings) have no Pallas
    # equivalent; their outputs are emulated with random tensors.
    key = jax.random.PRNGKey(0)

    # Test 1: small single-tile case, f32 streaming, tight tolerance.
    B, R, D, L = 2, 4, 128, 16
    k1, k2, k3, k4 = jax.random.split(key, 4)
    resp = jax.random.normal(k1, (B, R, D), dtype=jnp.float32)
    labs = jax.random.normal(k2, (L, D), dtype=jnp.float32)
    out_f32 = llava2_logits(resp, labs, matmul_dtype=jnp.float32)
    jax.block_until_ready(out_f32)
    ref = _reference(resp, labs)
    assert out_f32.shape == (B, L)
    assert jnp.allclose(out_f32, ref, atol=1e-5, rtol=1e-5)

    # Test 2: multi-tile ragged label table, bf16 streaming (default/fast path).
    B2, R2, D2, L2 = 2, 3, 96, 300
    resp2 = jax.random.normal(k3, (B2, R2, D2), dtype=jnp.float32)
    labs2 = jax.random.normal(k4, (L2, D2), dtype=jnp.float32)
    out_bf16 = llava2_logits(resp2, labs2)          # bf16 labels, >=2 grid steps
    jax.block_until_ready(out_bf16)
    ref2 = _reference(resp2, labs2)
    assert out_bf16.shape == (B2, L2)
    assert jnp.allclose(out_bf16, ref2, atol=2e-2, rtol=2e-2)

    print("KERNEL_OK")
</pallas_src>

<mosaic_0001>
module attributes {stable_mosaic.version = 11 : i64} {
  func.func @_pool_kernel(%arg0: i32, %arg1: memref<2x4x128xf32, #tpu.memory_space<vmem>>, %arg2: memref<2x128xf32, #tpu.memory_space<vmem>>) attributes {dimension_semantics = [#tpu.dimension_semantics<arbitrary>], iteration_bounds = array<i64: 1>, scalar_prefetch = 0 : i64, scratch_operands = 0 : i64, tpu.core_type = #tpu.core_type<tc>, window_params = [{pipeline_mode = #tpu.pipeline_mode<synchronous>, transform_indices = @transform_0, window_bounds = array<i64: 2, 4, 128>}, {pipeline_mode = #tpu.pipeline_mode<synchronous>, transform_indices = @transform_1, window_bounds = array<i64: 2, 128>}]} {
    %c0 = arith.constant 0 : index
    %c0_0 = arith.constant 0 : index
    %c0_1 = arith.constant 0 : index
    %0 = vector.load %arg1[%c0, %c0_0, %c0_1] : memref<2x4x128xf32, #tpu.memory_space<vmem>>, vector<2x4x128xf32>
    %1 = arith.mulf %0, %0 : vector<2x4x128xf32>
    %cst = arith.constant dense<0.000000e+00> : vector<2x4xf32>
    %2 = vector.multi_reduction <add>, %1, %cst [2] : vector<2x4x128xf32> to vector<2x4xf32>
    %3 = vector.shape_cast %2 : vector<2x4xf32> to vector<2x4x1xf32>
    %cst_2 = arith.constant 1.000000e-24 : f32
    %4 = vector.broadcast %cst_2 : f32 to vector<2x4x1xf32>
    %5 = arith.maximumf %3, %4 : vector<2x4x1xf32>
    %6 = math.rsqrt %5 : vector<2x4x1xf32>
    %7 = vector.broadcast %6 : vector<2x4x1xf32> to vector<2x4x128xf32>
    %8 = arith.mulf %0, %7 : vector<2x4x128xf32>
    %cst_3 = arith.constant dense<0.000000e+00> : vector<2x128xf32>
    %9 = vector.multi_reduction <add>, %8, %cst_3 [1] : vector<2x4x128xf32> to vector<2x128xf32>
    %cst_4 = arith.constant 4.000000e+00 : f32
    %10 = vector.broadcast %cst_4 : f32 to vector<2x128xf32>
    %11 = arith.divf %9, %10 : vector<2x128xf32>
    %c0_5 = arith.constant 0 : index
    %c0_6 = arith.constant 0 : index
    %12 = vector.load %arg2[%c0_5, %c0_6] : memref<2x128xf32, #tpu.memory_space<vmem>>, vector<2x128xf32>
    tpu.vector_store %arg2[%c0_5, %c0_6], %11 {strides = array<i32>} : memref<2x128xf32, #tpu.memory_space<vmem>>, vector<2x128xf32>,
    return
  }
  func.func @transform_0(%arg0: i32) -> (i32, i32, i32) {
    %c0_i32 = arith.constant 0 : i32
    %c0_i32_0 = arith.constant 0 : i32
    %c0_i32_1 = arith.constant 0 : i32
    %c0_i32_2 = arith.constant 0 : i32
    return %c0_i32, %c0_i32_0, %c0_i32_1 : i32, i32, i32
  }
  func.func @transform_1(%arg0: i32) -> (i32, i32) {
    %c0_i32 = arith.constant 0 : i32
    %c0_i32_0 = arith.constant 0 : i32
    %c0_i32_1 = arith.constant 0 : i32
    return %c0_i32, %c0_i32_0 : i32, i32
  }
}

</mosaic_0001>

<bundles_post_ra>
// kernel: tpu_custom_call.1
= control target key start
LH: loop header
LB: loop body
LE: loop exit
PB: predicated region body
PF: predicated region fallthrough
CT: control target
= control target key end

     0   :  { %6 = vsyncpa [#allocation3], 0  ;;  %s154_s0 = inlined_call_operand.hbm [shape: f32[2,4,128], index: 0, kind: input, shape index: {}]   ;;  %s155_s1 = inlined_call_operand.hbm [shape: f32[2,128], index: 1, kind: output, shape index: {}]  }
   0x1   :  { %7 = vsyncpa [#allocation4], 0  ;;  %s130_s6 = smov [#allocation2]  }
   0x2   :  { %s13_s7 = sshll.u32 %s130_s6, 4  ;;  %s14_s7 = int_to_ptr.vmem [resolvable:$true] %s13_s7 }
   0x3   :  { %s94_s8 = scalar_lea.vmem %s14_s7, 128  ;;  %p99_p1 = scmp.lt.s32.totalorder %s14_s7, %s14_s7 }
   0x4   :  { %p95_p0 = scmp.ne.s32.totalorder %s14_s7, %s94_s8  ;;  %p100_p2 = scmp.lt.s32.totalorder %s94_s8, %s94_s8 }
   0x6   :  { %p101_p3 = por %p100_p2, %p99_p1 }
   0x8   :  { %p102_p4 = pnand %p101_p3, %p95_p0 }
   0xa   :  { %105 = shalt.err (!%p102_p4)
}
   0xb   :  { %s131_s9 = smov 64   ;;  %s132_s10 = smov 4  }
   0xc   :  { %19 = dma.hbm_to_vmem [thread:$0]  %s154_s0, 128, %s14_s7, [#allocation3], %s131_s9, %s131_s9, %s132_s10  }
   0xd   :  { %126 = dma.done.wait [#allocation3], 128  }
   0xe   :  { %127 = vsyncadd [#allocation3], 4294967168  ;;  %v23_v0 = vld [vmem:[#allocation2] sm:$0xf]  ;;  %vm27_vm0 = vcmask 1043456   ;;  %s133_s0 = smov [#allocation5]  }
   0xf   :  { %v24_v1 = vld [vmem:[#allocation2 + $0x4] sm:$0xf]  ;;  %v25_v2 = vmul.f32 %v23_v0, %v23_v0  ;;  %s69_s13 = sshll.u32 %s133_s0, 4  ;;  %vm59_vm1 = vcmask 1041409   ;;  %s70_s13 = int_to_ptr.vmem [resolvable:$true] %s69_s13 }
  0x10   :  { %v26_v3 = vmul.f32 %v24_v1, %v24_v1  ;;  %s106_s14 = scalar_lea.vmem %s70_s13, 32  ;;  %p111_p6 = scmp.lt.s32.totalorder %s70_s13, %s70_s13 }
  0x11   :  { %v28_v4 = vsel %vm27_vm0, %v25_v2, 0.0  ;;  %p107_p5 = scmp.ne.s32.totalorder %s70_s13, %s106_s14  ;;  %p112_p7 = scmp.lt.s32.totalorder %s106_s14, %s106_s14 }
  0x12   :  { %29 = vadd.xlane.f32.xlu0 %v28_v4  ;;  %v31_v5 = vsel %vm27_vm0, %v26_v3, 0.0 }
  0x13   :  { %p113_p8 = por %p112_p7, %p111_p6 }
  0x15   :  { %p114_p9 = pnand %p113_p8, %p107_p5 }
  0x16   :  { %32 = vadd.xlane.f32.xlu0 %v31_v5 }
  0x9b   :  { %v30_v6 = vpop.xlane.xlu0 %29 }
  0x9c   :  { %v34_v7 = vmax.f32 %v30_v6, 1e-24 }
  0x9e   :  { %82 = vrsqrt.f32 %v34_v7 }
  0x9f   :  { %v33_v8 = vpop.xlane.xlu0 %32 }
  0xa0   :  { %v35_v9 = vmax.f32 %v33_v8, 1e-24 }
  0xa2   :  { %84 = vrsqrt.f32 %v35_v9 }
  0xab   :  { %v83_v10 = vpop.eup %82 }
  0xac   :  { %v38_v11 = vmul.f32 %v83_v10, %v23_v0 }
  0xae   :  { %v40_v12 = vsel %vm27_vm0, %v38_v11, 0.0 }
  0xaf   :  { %v85_v13 = vpop.eup %84  ;;  %v41_v14 = vrot.slane %v40_v12, 4 }
  0xb0   :  { %v39_v15 = vmul.f32 %v85_v13, %v24_v1 }
  0xb1   :  { %v42_v16 = vadd.f32 %v41_v14, %v40_v12 }
  0xb2   :  { %v47_v17 = vsel %vm27_vm0, %v39_v15, 0.0 }
  0xb3   :  { %v43_v18 = vrot.slane %v42_v16, 2  ;;  %v48_v19 = vrot.slane %v47_v17, 4 }
  0xb5   :  { %v44_v20 = vadd.f32 %v43_v18, %v42_v16  ;;  %v49_v21 = vadd.f32 %v48_v19, %v47_v17 }
  0xb7   :  { %v45_v22 = vrot.slane %v44_v20, 1  ;;  %v50_v23 = vrot.slane %v49_v21, 2 }
  0xb9   :  { %v51_v24 = vadd.f32 %v50_v23, %v49_v21  ;;  %v46_v25 = vadd.f32 %v45_v22, %v44_v20 }
  0xbb   :  { %v52_v26 = vrot.slane %v51_v24, 1  ;;  %v55_v28 = vmul.f32 0.25, %v46_v25 }
  0xbd   :  { %v53_v27 = vadd.f32 %v52_v26, %v51_v24 }
  0xbf   :  { %v56_v29 = vmul.f32 0.25, %v53_v27 }
  0xc1   :  { %v60_v30 = vsel %vm59_vm1, %v56_v29, %v55_v28 }
  0xc2   :  { %62 = vst [vmem:[#allocation5] sm:$0x3] %v60_v30 }
  0xc3   :  { %117 = shalt.err (!%p114_p9)
}
  0xc4   :  { %72 = dma.vmem_to_hbm [thread:$0]  %s70_s13, 32, %s155_s1, [#allocation4]  }
  0xc5   :  { %128 = dma.done.wait [#allocation4], 32  }
  0xc6   :  { %129 = vsyncadd [#allocation4], 4294967264 }
  0xc7   :  { %76 = vsyncpa [#allocation3], 1 }
  0xc8   :  { %77 = vsyncpa [#allocation4], 1 }

</bundles_post_ra>
